<compile_context>
chip_gen: v7x
topology: tpu7x:2x2x1
jax: 0.10.0
libtpu: 0.0.40
codegen_flags: <defaults>
</compile_context>

<pallas_src>
import jax
import jax.numpy as jnp
from jax.experimental import pallas as pl
from jax.experimental.pallas import tpu as pltpu

HIDDEN = 32                      # fc1 output features (PyTorch spec)
LANE = 128                       # TPU lane width
MAX_TILE_B = 2048                # upper bound on rows per grid step
MIN_SPLIT_ROWS = 256             # only split the batch for megacore above this
VMEM_LIMIT_BYTES = 48 * 1024 * 1024   # <= v7x 64 MiB/TC; fine on v5e/v6e
NEG_BIAS = -1e30                 # bias for padded logit lanes -> softmax prob 0


def _round_up(x, m):
    return ((x + m - 1) // m) * m


def _choose_tile_b(B, d_in, pad_h, pad_out):
    """Pick the largest sublane-aligned batch tile that fits the VMEM budget."""
    itemsize = 4  # f32 streaming
    # Resident (constant index_map) blocks are double-buffered by default.
    resident = 2 * itemsize * (d_in * pad_h + pad_h + pad_h * pad_out + pad_out)
    budget = VMEM_LIMIT_BYTES - resident - (4 << 20)  # 4 MiB compiler headroom
    # Per-row bytes: 2x double-buffered x, 2x double-buffered (lane-padded)
    # output block, plus ~4 lane-wide f32 temporaries (h, logits, e, probs).
    per_row = itemsize * (2 * d_in + 2 * LANE + 4 * LANE)
    tile = max(8, budget // per_row)
    tile = min(tile, MAX_TILE_B)
    tile = min(tile, _round_up(B, 8))            # never larger than the batch
    if B >= 2 * MIN_SPLIT_ROWS:
        # >= 2 grid steps so v7x's second TensorCore gets work.
        tile = min(tile, _round_up(-(-B // 2), 8))
    return max(8, (tile // 8) * 8)


def actor_kernel(x_ref, w1_ref, b1_ref, w2_ref, b2_ref, o_ref):
    """One batch tile: fused fc1 + ReLU + fc2 + softmax, narrow (d_out) store."""
    x = x_ref[...]                                            # (TILE_B, D_in)

    # fc1 + ReLU — MXU matmul with f32 accumulation; bias/activation in f32.
    h = jnp.dot(x, w1_ref[...], preferred_element_type=jnp.float32) + b1_ref[...]
    h = jnp.maximum(h, 0.0)                                   # (TILE_B, 128); padded cols exactly 0

    # fc2 -> logits.  Padded logit lanes carry bias -1e30 (softmax mass 0).
    logits = jnp.dot(h.astype(w2_ref.dtype), w2_ref[...],
                     preferred_element_type=jnp.float32) + b2_ref[...]

    # Numerically stable softmax over the feature axis (dim=1).
    m = jnp.max(logits, axis=1, keepdims=True)
    e = jnp.exp(logits - m)
    denom = jnp.sum(e, axis=1, keepdims=True)
    probs = e * pl.reciprocal(denom, approx=True)             # EUP reciprocal (idle slot)

    # Store only the real d_out lanes -> narrow HBM writeback (no 32x padding).
    o_ref[...] = probs[:, : o_ref.shape[-1]].astype(o_ref.dtype)


def actor_forward(x, w1, b1, w2, b2, *, tile_b=None):
    """x: (B, D_in). w1: (D_in, 32), b1: (1, 32), w2: (32, D_out), b2: (1, D_out).
    Returns softmax probabilities (B, D_out) in float32."""
    B, d_in = x.shape
    d_out = w2.shape[1]

    pad_h = _round_up(HIDDEN, LANE)          # 32 -> 128 (lane-dense hidden)
    pad_out = _round_up(d_out, LANE)         # d_out -> 128 (lane-dense logits)

    if tile_b is None:
        tile_b = _choose_tile_b(B, d_in, pad_h, pad_out)

    # Only the (tiny, resident) weights/biases are padded in the wrapper; x is
    # streamed untouched and the output is produced at its true (B, d_out)
    # shape, so there are no extra wrapper-side HBM passes over the batch.
    w1p = jnp.pad(w1, ((0, 0), (0, pad_h - HIDDEN))).astype(x.dtype)
    b1p = jnp.pad(b1, ((0, 0), (0, pad_h - HIDDEN))).astype(jnp.float32)
    w2p = jnp.pad(w2, ((0, pad_h - HIDDEN), (0, pad_out - d_out))).astype(x.dtype)
    b2p = jnp.pad(b2, ((0, 0), (0, pad_out - d_out)),
                  constant_values=NEG_BIAS).astype(jnp.float32)

    grid = (pl.cdiv(B, tile_b),)             # ragged final block masked by Pallas

    return pl.pallas_call(
        actor_kernel,
        out_shape=jax.ShapeDtypeStruct((B, d_out), jnp.float32),
        grid_spec=pltpu.PrefetchScalarGridSpec(
            num_scalar_prefetch=0,
            grid=grid,
            in_specs=[
                pl.BlockSpec((tile_b, d_in), lambda i: (i, 0)),    # x: batch-tiled
                pl.BlockSpec((d_in, pad_h), lambda i: (0, 0)),     # w1: resident
                pl.BlockSpec((1, pad_h), lambda i: (0, 0)),        # b1: resident
                pl.BlockSpec((pad_h, pad_out), lambda i: (0, 0)),  # w2: resident
                pl.BlockSpec((1, pad_out), lambda i: (0, 0)),      # b2: resident
            ],
            out_specs=pl.BlockSpec((tile_b, d_out), lambda i: (i, 0)),  # narrow store
        ),
        compiler_params=pltpu.CompilerParams(
            dimension_semantics=("parallel",),       # megacore-shard batch axis
            vmem_limit_bytes=VMEM_LIMIT_BYTES,
        ),
    )(x, w1p, b1p, w2p, b2p)


def init_params(key, input_dim, output_dim):
    """Deterministic init mimicking nn.Linear's U(-1/sqrt(fan_in), 1/sqrt(fan_in))."""
    k1, k2, k3, k4 = jax.random.split(key, 4)
    bound1 = 1.0 / jnp.sqrt(jnp.float32(input_dim))
    bound2 = 1.0 / jnp.sqrt(jnp.float32(HIDDEN))
    # Stored as (in, out) == transpose of PyTorch's (out, in).
    w1 = jax.random.uniform(k1, (input_dim, HIDDEN), jnp.float32, -bound1, bound1)
    b1 = jax.random.uniform(k2, (1, HIDDEN), jnp.float32, -bound1, bound1)
    w2 = jax.random.uniform(k3, (HIDDEN, output_dim), jnp.float32, -bound2, bound2)
    b2 = jax.random.uniform(k4, (1, output_dim), jnp.float32, -bound2, bound2)
    return w1, b1, w2, b2


def actor_reference(x, w1, b1, w2, b2):
    h = jnp.maximum(x @ w1 + b1, 0.0)
    logits = h @ w2 + b2
    return jax.nn.softmax(logits, axis=1)


if __name__ == "__main__":
    input_dim, output_dim, batch = 16, 4, 2

    key = jax.random.PRNGKey(0)
    kx, kp = jax.random.split(key)
    x = jax.random.normal(kx, (batch, input_dim), jnp.float32)
    w1, b1, w2, b2 = init_params(kp, input_dim, output_dim)

    ref = actor_reference(x, w1, b1, w2, b2)
    probs = jax.block_until_ready(actor_forward(x, w1, b1, w2, b2))
    assert probs.shape == (batch, output_dim)
    assert jnp.allclose(probs, ref, atol=2e-3)
    assert jnp.allclose(jnp.sum(probs, axis=1), 1.0, atol=2e-3)

    # Larger ragged batch: exercises multi-step grid (both TCs on v7x) and the
    # masked final partial tile (no wrapper pad / slice involved).
    B2 = 515
    x2 = jax.random.normal(kx, (B2, input_dim), jnp.float32)
    ref2 = actor_reference(x2, w1, b1, w2, b2)
    probs2 = jax.block_until_ready(actor_forward(x2, w1, b1, w2, b2))
    assert probs2.shape == (B2, output_dim)
    assert jnp.allclose(probs2, ref2, atol=2e-3)
    assert jnp.allclose(jnp.sum(probs2, axis=1), 1.0, atol=2e-3)

    print("KERNEL_OK")
</pallas_src>

<mosaic_0001>
module attributes {stable_mosaic.version = 11 : i64} {
  func.func @actor_kernel(%arg0: i32, %arg1: memref<8x16xf32, #tpu.memory_space<vmem>>, %arg2: memref<16x128xf32, #tpu.memory_space<vmem>>, %arg3: memref<1x128xf32, #tpu.memory_space<vmem>>, %arg4: memref<128x128xf32, #tpu.memory_space<vmem>>, %arg5: memref<1x128xf32, #tpu.memory_space<vmem>>, %arg6: memref<8x4xf32, #tpu.memory_space<vmem>>) attributes {dimension_semantics = [#tpu.dimension_semantics<parallel>], iteration_bounds = array<i64: 1>, scalar_prefetch = 0 : i64, scratch_operands = 0 : i64, tpu.core_type = #tpu.core_type<tc>, window_params = [{transform_indices = @transform_0, window_bounds = array<i64: 8, 16>}, {pipeline_mode = #tpu.pipeline_mode<synchronous>, transform_indices = @transform_1, window_bounds = array<i64: 16, 128>}, {pipeline_mode = #tpu.pipeline_mode<synchronous>, transform_indices = @transform_2, window_bounds = array<i64: 1, 128>}, {pipeline_mode = #tpu.pipeline_mode<synchronous>, transform_indices = @transform_3, window_bounds = array<i64: 128, 128>}, {pipeline_mode = #tpu.pipeline_mode<synchronous>, transform_indices = @transform_4, window_bounds = array<i64: 1, 128>}, {transform_indices = @transform_5, window_bounds = array<i64: 8, 4>}]} {
    %c0 = arith.constant 0 : index
    %c0_0 = arith.constant 0 : index
    %0 = vector.load %arg1[%c0, %c0_0] : memref<8x16xf32, #tpu.memory_space<vmem>>, vector<8x16xf32>
    %c0_1 = arith.constant 0 : index
    %c0_2 = arith.constant 0 : index
    %1 = vector.load %arg2[%c0_1, %c0_2] : memref<16x128xf32, #tpu.memory_space<vmem>>, vector<16x128xf32>
    %cst = arith.constant dense<0.000000e+00> : vector<8x128xf32>
    %2 = tpu.matmul %0, %1, %cst {dimension_numbers = #tpu.dot_dimension_numbers<[1], [0], [0], [1], [0, 0, 1, 1], [], []>} : vector<8x16xf32>, vector<16x128xf32>, vector<8x128xf32> -> vector<8x128xf32>
    %c0_3 = arith.constant 0 : index
    %c0_4 = arith.constant 0 : index
    %3 = vector.load %arg3[%c0_3, %c0_4] : memref<1x128xf32, #tpu.memory_space<vmem>>, vector<1x128xf32>
    %4 = vector.broadcast %3 : vector<1x128xf32> to vector<8x128xf32>
    %5 = arith.addf %2, %4 : vector<8x128xf32>
    %cst_5 = arith.constant 0.000000e+00 : f32
    %6 = vector.broadcast %cst_5 : f32 to vector<8x128xf32>
    %7 = arith.maximumf %5, %6 : vector<8x128xf32>
    %c0_6 = arith.constant 0 : index
    %c0_7 = arith.constant 0 : index
    %8 = vector.load %arg4[%c0_6, %c0_7] : memref<128x128xf32, #tpu.memory_space<vmem>>, vector<128x128xf32>
    %cst_8 = arith.constant dense<0.000000e+00> : vector<8x128xf32>
    %9 = tpu.matmul %7, %8, %cst_8 {dimension_numbers = #tpu.dot_dimension_numbers<[1], [0], [0], [1], [0, 0, 1, 1], [], []>} : vector<8x128xf32>, vector<128x128xf32>, vector<8x128xf32> -> vector<8x128xf32>
    %c0_9 = arith.constant 0 : index
    %c0_10 = arith.constant 0 : index
    %10 = vector.load %arg5[%c0_9, %c0_10] : memref<1x128xf32, #tpu.memory_space<vmem>>, vector<1x128xf32>
    %11 = vector.broadcast %10 : vector<1x128xf32> to vector<8x128xf32>
    %12 = arith.addf %9, %11 : vector<8x128xf32>
    %cst_11 = arith.constant dense<0xFF800000> : vector<8xf32>
    %13 = vector.multi_reduction <maximumf>, %12, %cst_11 [1] : vector<8x128xf32> to vector<8xf32>
    %14 = vector.shape_cast %13 : vector<8xf32> to vector<8x1xf32>
    %15 = vector.broadcast %14 : vector<8x1xf32> to vector<8x128xf32>
    %16 = arith.subf %12, %15 : vector<8x128xf32>
    %17 = math.exp %16 : vector<8x128xf32>
    %cst_12 = arith.constant dense<0.000000e+00> : vector<8xf32>
    %18 = vector.multi_reduction <add>, %17, %cst_12 [1] : vector<8x128xf32> to vector<8xf32>
    %19 = vector.shape_cast %18 : vector<8xf32> to vector<8x1xf32>
    %20 = tpu.reciprocal %19 {approx = true} : vector<8x1xf32> -> vector<8x1xf32>
    %21 = vector.broadcast %20 : vector<8x1xf32> to vector<8x128xf32>
    %22 = arith.mulf %17, %21 : vector<8x128xf32>
    %23 = vector.extract_strided_slice %22 {offsets = [0, 0], sizes = [8, 4], strides = [1, 1]} : vector<8x128xf32> to vector<8x4xf32>
    %c0_13 = arith.constant 0 : index
    %c0_14 = arith.constant 0 : index
    %24 = vector.load %arg6[%c0_13, %c0_14] : memref<8x4xf32, #tpu.memory_space<vmem>>, vector<8x4xf32>
    tpu.vector_store %arg6[%c0_13, %c0_14], %23 {strides = array<i32>} : memref<8x4xf32, #tpu.memory_space<vmem>>, vector<8x4xf32>,
    return
  }
  func.func @transform_0(%arg0: i32) -> (i32, i32) {
    %c0_i32 = arith.constant 0 : i32
    %c0_i32_0 = arith.constant 0 : i32
    return %arg0, %c0_i32 : i32, i32
  }
  func.func @transform_1(%arg0: i32) -> (i32, i32) {
    %c0_i32 = arith.constant 0 : i32
    %c0_i32_0 = arith.constant 0 : i32
    %c0_i32_1 = arith.constant 0 : i32
    return %c0_i32, %c0_i32_0 : i32, i32
  }
  func.func @transform_2(%arg0: i32) -> (i32, i32) {
    %c0_i32 = arith.constant 0 : i32
    %c0_i32_0 = arith.constant 0 : i32
    %c0_i32_1 = arith.constant 0 : i32
    return %c0_i32, %c0_i32_0 : i32, i32
  }
  func.func @transform_3(%arg0: i32) -> (i32, i32) {
    %c0_i32 = arith.constant 0 : i32
    %c0_i32_0 = arith.constant 0 : i32
    %c0_i32_1 = arith.constant 0 : i32
    return %c0_i32, %c0_i32_0 : i32, i32
  }
  func.func @transform_4(%arg0: i32) -> (i32, i32) {
    %c0_i32 = arith.constant 0 : i32
    %c0_i32_0 = arith.constant 0 : i32
    %c0_i32_1 = arith.constant 0 : i32
    return %c0_i32, %c0_i32_0 : i32, i32
  }
  func.func @transform_5(%arg0: i32) -> (i32, i32) {
    %c0_i32 = arith.constant 0 : i32
    %c0_i32_0 = arith.constant 0 : i32
    return %arg0, %c0_i32 : i32, i32
  }
}

</mosaic_0001>

<bundles_post_ra>
// kernel: tpu_custom_call.1
= control target key start
LH: loop header
LB: loop body
LE: loop exit
PB: predicated region body
PF: predicated region fallthrough
CT: control target
= control target key end

     0   :  { %10 = vsyncpa [#allocation3], 0  ;;  %s577_s0 = inlined_call_operand.hbm [shape: f32[2,16], index: 0, kind: input, shape index: {}]   ;;  %s578_s1 = inlined_call_operand.hbm [shape: f32[16,128], index: 1, kind: input, shape index: {}]   ;;  %s579_s2 = inlined_call_operand.vmem [shape: f32[1,128], index: 2, kind: input, shape index: {}]   ;;  %s580_s3 = inlined_call_operand.hbm [shape: f32[128,128], index: 3, kind: input, shape index: {}]   ;;  %s581_s4 = inlined_call_operand.vmem [shape: f32[1,128], index: 4, kind: input, shape index: {}]   ;;  %s582_s5 = inlined_call_operand.hbm [shape: f32[2,4], index: 5, kind: output, shape index: {}]  }
   0x1   :  { %11 = vsyncpa [#allocation6], 0 }
   0x2   :  { %12 = vsyncpa [#allocation4], 0 }
   0x3   :  { %17 = vsyncadd [#allocation3], 96  ;;  %s470_s18 = smov [#allocation5]   ;;  %s376_s22 = scalar_lea.hbm %s578_s1, 256 }
   0x4   :  { %s30_s19 = sshll.u32 %s470_s18, 4  ;;  %p377_p0 = scmp.ne.s32.totalorder %s578_s1, %s376_s22  ;;  %s31_s19 = int_to_ptr.vmem [resolvable:$true] %s30_s19 }
   0x5   :  { %p380_p1 = scmp.lt.u32.totalorder %s376_s22, %s578_s1 }
   0x7   :  { %p382_p2 = pnand %p380_p1, %p377_p0 }
   0x9   :  { %385 = shalt.err (!%p382_p2)
}
   0xa   :  { %s386_s27 = scalar_lea.vmem %s31_s19, 256  ;;  %p391_p4 = scmp.lt.s32.totalorder %s31_s19, %s31_s19 }
   0xb   :  { %p387_p3 = scmp.ne.s32.totalorder %s31_s19, %s386_s27  ;;  %p392_p5 = scmp.lt.s32.totalorder %s386_s27, %s386_s27 }
   0xd   :  { %p393_p6 = por %p392_p5, %p391_p4 }
   0xf   :  { %p394_p7 = pnand %p393_p6, %p387_p3 }
  0x11   :  { %397 = shalt.err (!%p394_p7)
}
  0x12   :  { %s471_s28 = smov 128   ;;  %s472_s29 = smov 8  }
  0x13   :  { %36 = dma.hbm_to_vmem [thread:$0]  %s578_s1, 256, %s31_s19, [#allocation6], %s471_s28, %s471_s28, %s472_s29  }
  0x14   :  { %s473_s7 = smov [#allocation2]   ;;  %s398_s11 = scalar_lea.hbm %s577_s0, 32 }
  0x15   :  { %s18_s8 = sshll.u32 %s473_s7, 4  ;;  %p399_p8 = scmp.ne.s32.totalorder %s577_s0, %s398_s11  ;;  %s19_s8 = int_to_ptr.vmem [resolvable:$true] %s18_s8 }
  0x16   :  { %p402_p9 = scmp.lt.u32.totalorder %s398_s11, %s577_s0 }
  0x18   :  { %p404_p10 = pnand %p402_p9, %p399_p8 }
  0x1a   :  { %407 = shalt.err (!%p404_p10)
}
  0x1b   :  { %s408_s16 = scalar_lea.vmem %s19_s8, 32  ;;  %s412_s1 = scalar_lea.vmem %s19_s8, 128 }
  0x1c   :  { %p409_p11 = scmp.ne.s32.totalorder %s19_s8, %s408_s16  ;;  %p413_p12 = scmp.lt.s32.totalorder %s19_s8, %s19_s8 }
  0x1d   :  { %p414_p13 = scmp.lt.s32.totalorder %s412_s1, %s408_s16 }
  0x1f   :  { %p415_p0 = por %p414_p13, %p413_p12 }
  0x21   :  { %p416_p1 = pnand %p415_p0, %p409_p11 }
  0x23   :  { %419 = shalt.err (!%p416_p1)
}
  0x24   :  { %s474_s17 = smov 32   ;;  %s475_s18 = smov 2  }
  0x25   :  { %24 = dma.hbm_to_vmem [thread:$0]  %s577_s0, 32, %s19_s8, [#allocation3], %s474_s17, %s474_s17, %s475_s18  }
  0x26   :  { %s476_s21 = smov [#allocation7]   ;;  %s420_s25 = scalar_lea.hbm %s580_s3, 2048 }
  0x27   :  { %s44_s22 = sshll.u32 %s476_s21, 4  ;;  %p421_p2 = scmp.ne.s32.totalorder %s580_s3, %s420_s25  ;;  %s45_s22 = int_to_ptr.vmem [resolvable:$true] %s44_s22 }
  0x28   :  { %p424_p3 = scmp.lt.u32.totalorder %s420_s25, %s580_s3 }
  0x2a   :  { %p426_p4 = pnand %p424_p3, %p421_p2 }
  0x2c   :  { %429 = shalt.err (!%p426_p4)
}
  0x2d   :  { %s430_s7 = scalar_lea.vmem %s45_s22, 2048  ;;  %p435_p6 = scmp.lt.s32.totalorder %s45_s22, %s45_s22 }
  0x2e   :  { %p431_p5 = scmp.ne.s32.totalorder %s45_s22, %s430_s7  ;;  %p436_p7 = scmp.lt.s32.totalorder %s430_s7, %s430_s7 }
  0x30   :  { %p437_p8 = por %p436_p7, %p435_p6 }
  0x32   :  { %p438_p9 = pnand %p437_p8, %p431_p5 }
  0x34   :  { %441 = shalt.err (!%p438_p9)
}
  0x35   :  { %50 = dma.hbm_to_vmem [thread:$0]  %s580_s3, 2048, %s45_s22, [#allocation6], %s471_s28, %s471_s28, %s472_s29  }
  0x36   :  { %464 = dma.done.wait [#allocation3], 128  }
  0x37   :  { %465 = vsyncadd [#allocation3], 4294967168 }
  0x38   :  { %466 = dma.done.wait [#allocation6], 2304  }
  0x39   :  { %467 = vsyncadd [#allocation6], 4294964992  ;;  %v477_v0 = vmov 0.0|0.0   ;;  %vm478_vm0 = vmmov 0   ;;  %v479_v1 = vmov 0.0   ;;  %v63_v2 = vld [vmem:[#allocation5] sm:$0xff] }
  0x3a   :  { %334 = vmatprep.subr.bf16.mxu0 %v477_v0  ;;  %296 = vmatprep.mubr.msk.f32.mxu0 %vm478_vm0, %v479_v1  ;;  %v64_v3 = vld [vmem:[#allocation5 + $0x8] sm:$0xff]  ;;  %v147_v5 = vld [vmem:[#allocation7] sm:$0xff]  ;;  %v148_v6 = vld [vmem:[#allocation7 + $0x8] sm:$0xff]  ;;  %vm72_vm1 = vcmask 130048   ;;  %vm249_vm2 = vcmask 31744  }
  0x3b   :  { %337 = vmatprep.subr.bf16.mxu1 %v477_v0  ;;  %331 = vmatprep.mubr.msk.f32.mxu1 %vm478_vm0, %v479_v1  ;;  %v335_v4 = vpack.c.bf16 %v64_v3, %v63_v2  ;;  %v149_v7 = vld [vmem:[#allocation7 + $0x10] sm:$0xff]  ;;  %v338_v8 = vpack.c.bf16 %v148_v6, %v147_v5  ;;  %v150_v9 = vld [vmem:[#allocation7 + $0x18] sm:$0xff]  ;;  %v62_v10 = vld [vmem:[#allocation2] sm:$0xff] }
  0x3c   :  { %v341_v11 = vpack.c.bf16 %v150_v9, %v149_v7  ;;  %v151_v12 = vld [vmem:[#allocation7 + $0x20] sm:$0xff]  ;;  %v152_v13 = vld [vmem:[#allocation7 + $0x28] sm:$0xff]  ;;  %v153_v15 = vld [vmem:[#allocation7 + $0x30] sm:$0xff] }
  0x3d   :  { %336 = vmatpush3.bf16.msra.mxu0 %v335_v4  ;;  %339 = vmatpush3.bf16.msra.mxu1 %v338_v8  ;;  %v344_v14 = vpack.c.bf16 %v152_v13, %v151_v12  ;;  %v154_v16 = vld [vmem:[#allocation7 + $0x38] sm:$0xff]  ;;  %v155_v18 = vld [vmem:[#allocation7 + $0x40] sm:$0xff]  ;;  %v156_v19 = vld [vmem:[#allocation7 + $0x48] sm:$0xff] }
  0x3e   :  { %340 = vmatprep.subr.bf16.mxu1 %v477_v0  ;;  %v347_v17 = vpack.c.bf16 %v154_v16, %v153_v15  ;;  %v350_v20 = vpack.c.bf16 %v156_v19, %v155_v18  ;;  %v157_v21 = vld [vmem:[#allocation7 + $0x50] sm:$0xff]  ;;  %v158_v22 = vld [vmem:[#allocation7 + $0x58] sm:$0xff]  ;;  %v159_v24 = vld [vmem:[#allocation7 + $0x60] sm:$0xff] }
  0x3f   :  { %v353_v23 = vpack.c.bf16 %v158_v22, %v157_v21  ;;  %v160_v25 = vld [vmem:[#allocation7 + $0x68] sm:$0xff]  ;;  %v161_v27 = vld [vmem:[#allocation7 + $0x70] sm:$0xff]  ;;  %v162_v28 = vld [vmem:[#allocation7 + $0x78] sm:$0xff] }
  0x40   :  { %297 = vmatmul.mubr.msk.f32.vlgmr.msra.gmra.mrb[0].mxu0 %vm72_vm1, %v62_v10  ;;  %v356_v26 = vpack.c.bf16 %v160_v25, %v159_v24  ;;  %v359_v29 = vpack.c.bf16 %v162_v28, %v161_v27  ;;  %v269_v30 = vld [vmem:[%s579_s2] ss:$0 sm:$0xff] }
  0x41   :  { %342 = vmatpush3.bf16.msra.mxu1 %v341_v11  ;;  %v271_v35 = vld [vmem:[%s581_s4] ss:$0 sm:$0xff] }
  0x42   :  { %343 = vmatprep.subr.bf16.mxu1 %v477_v0 }
  0x45   :  { %345 = vmatpush3.bf16.msra.mxu1 %v344_v14 }
  0x46   :  { %346 = vmatprep.subr.bf16.mxu1 %v477_v0 }
  0x49   :  { %348 = vmatpush3.bf16.msra.mxu1 %v347_v17 }
  0x4a   :  { %349 = vmatprep.subr.bf16.mxu1 %v477_v0 }
  0x4d   :  { %351 = vmatpush3.bf16.msra.mxu1 %v350_v20 }
  0x4e   :  { %352 = vmatprep.subr.bf16.mxu1 %v477_v0 }
  0x51   :  { %354 = vmatpush3.bf16.msra.mxu1 %v353_v23 }
  0x52   :  { %355 = vmatprep.subr.bf16.mxu1 %v477_v0 }
  0x55   :  { %357 = vmatpush3.bf16.msra.mxu1 %v356_v26 }
  0x56   :  { %358 = vmatprep.subr.bf16.mxu1 %v477_v0 }
  0x59   :  { %360 = vmatpush3.bf16.msra.mxu1 %v359_v29 }
 0x113   :  { %v142_v31 = vpop.f32.mrb[0].mxu0 }
 0x114   :  { %v143_v32 = vadd.f32 %v269_v30, %v142_v31  ;;  %v298_v33 = vpop.f32.mrb[1].mxu0 }
 0x116   :  { %v146_v34 = vmax.f32 %v143_v32, 0.0 }
 0x118   :  { %332 = vmatmul.mubr.f32.vlgmr.msra.gmra.mrb[0].mxu1 %v146_v34 }
 0x1eb   :  { %v236_v36 = vpop.f32.mrb[0].mxu1 }
 0x1ec   :  { %v237_v37 = vadd.f32 %v271_v35, %v236_v36  ;;  %v333_v38 = vpop.f32.mrb[1].mxu1 }
 0x1ee   :  { %240 = vmax.xlane.f32.xlu0 %v237_v37 }
 0x27b   :  { %v241_v39 = vpop.xlane.xlu0 %240 }
 0x27c   :  { %v242_v40 = vsub.f32 %v237_v37, %v241_v39 }
 0x27e   :  { %v243_v41 = vmul.f32 1.442695, %v242_v40 }
 0x280   :  { %372 = vpow2.f32 %v243_v41 }
 0x28a   :  { %v373_v42 = vpop.eup %372 }
 0x28b   :  { %245 = vadd.xlane.f32.xlu0 %v373_v42 }
 0x318   :  { %v246_v43 = vpop.xlane.xlu0 %245 }
 0x319   :  { %374 = vrcp.f32 %v246_v43 }
 0x323   :  { %v375_v44 = vpop.eup %374 }
 0x324   :  { %v248_v45 = vmul.f32 %v375_v44, %v373_v42 }
 0x326   :  { %250 = vst.msk [vmem:[#allocation8] sm:$0xff] %vm249_vm2, %v248_v45 }
 0x327   :  { %255 = vsyncadd [#allocation4], 96  ;;  %s480_s2 = smov [#allocation8]  }
 0x328   :  { %s256_s10 = sshll.u32 %s480_s2, 4  ;;  %s257_s10 = int_to_ptr.vmem [resolvable:$true] %s256_s10 }
 0x329   :  { %s442_s4 = scalar_lea.vmem %s257_s10, 32  ;;  %s446_s11 = scalar_lea.vmem %s257_s10, 128 }
 0x32a   :  { %p443_p10 = scmp.ne.s32.totalorder %s257_s10, %s442_s4  ;;  %p447_p11 = scmp.lt.s32.totalorder %s257_s10, %s257_s10 }
 0x32b   :  { %p448_p12 = scmp.lt.s32.totalorder %s446_s11, %s442_s4 }
 0x32d   :  { %p449_p13 = por %p448_p12, %p447_p11 }
 0x32f   :  { %p450_p0 = pnand %p449_p13, %p443_p10 }
 0x331   :  { %453 = shalt.err (!%p450_p0)
}
 0x332   :  { %s454_s14 = scalar_lea.hbm %s582_s5, 32 }
 0x333   :  { %p455_p1 = scmp.ne.s32.totalorder %s582_s5, %s454_s14  ;;  %p458_p2 = scmp.lt.u32.totalorder %s454_s14, %s582_s5 }
 0x335   :  { %p460_p3 = pnand %p458_p2, %p455_p1 }
 0x337   :  { %463 = shalt.err (!%p460_p3)
}
 0x338   :  { %262 = dma.vmem_to_hbm [thread:$0]  %s257_s10, 32, %s582_s5, [#allocation4], %s474_s17, %s474_s17, %s475_s18  }
 0x339   :  { %468 = dma.done.wait [#allocation4], 128  }
 0x33a   :  { %469 = vsyncadd [#allocation4], 4294967168 }
 0x33b   :  { %266 = vsyncpa [#allocation3], 1 }
 0x33c   :  { %267 = vsyncpa [#allocation6], 1 }
 0x33d   :  { %268 = vsyncpa [#allocation4], 1 }

</bundles_post_ra>
